<compile_context>
chip_gen: v7x
topology: tpu7x:2x2x1
jax: 0.10.0
libtpu: 0.0.40
codegen_flags: <defaults>
</compile_context>

<pallas_src>
import functools

import jax
import jax.numpy as jnp
from jax.experimental import pallas as pl
from jax.experimental.pallas import tpu as pltpu


# ---------------------------------------------------------------------------
# In-kernel helpers (only ops that lower cleanly on the TPU VPU / EUP / MXU)
# ---------------------------------------------------------------------------
def _gelu_erf(x):
    # PyTorch nn.GELU() default is erf-exact.  erf is evaluated with the
    # Abramowitz-Stegun 7.1.26 rational approximation (abs err < 1.5e-7),
    # which is f32-exact for practical purposes and needs only mul/add/exp.
    z = x * 0.7071067811865476            # x / sqrt(2)
    az = jnp.abs(z)
    t = 1.0 / (1.0 + 0.3275911 * az)
    poly = ((((1.061405429 * t - 1.453152027) * t + 1.421413741) * t
             - 0.284496736) * t + 0.254829592) * t
    erf_abs = 1.0 - poly * jnp.exp(-az * az)
    erf_z = jnp.where(z >= 0.0, erf_abs, -erf_abs)
    return 0.5 * x * (1.0 + erf_z)


def _layer_norm_unit(v):
    # PyTorch LayerNorm (biased variance, eps=1e-5) WITHOUT the affine part;
    # the affine weight/bias are folded into the following matmul at init.
    mu = jnp.mean(v, axis=-1, keepdims=True)
    var = jnp.mean((v - mu) ** 2, axis=-1, keepdims=True)
    return (v - mu) * jax.lax.rsqrt(var + 1e-5)


# ---------------------------------------------------------------------------
# Fused Block_CA kernel: one grid step processes a block of `Bb` batch rows.
# ---------------------------------------------------------------------------
def _block_ca_kernel(x_ref, xcls_ref, wqkv_ref, wproj_ref, wfc1_ref, wfc2_ref,
                     pk_ref, ycls_ref, attn_ref):
    f32 = jnp.float32
    Bb, N, C = x_ref.shape
    H = attn_ref.shape[1]
    hidden = wfc1_ref.shape[1]

    x2 = x_ref[...].reshape(Bb * N, C)          # patch tokens (Bb*N, C)
    xc = xcls_ref[:, 0, :]                      # cls tokens   (Bb, C)

    # Packed small vectors (single DMA): 4 folded biases + head selector S_T.
    b_qkv = pk_ref[0:1, 0:3 * C]                # (1, 3C)  = n1_b @ [wq*s|wk|wv]
    b_proj = pk_ref[1:2, 0:C]                   # (1, C)   gamma_1 folded
    b_fc1 = pk_ref[2:3, 0:hidden]               # (1, hidden) norm2 folded
    b_fc2 = pk_ref[3:4, 0:C]                    # (1, C)   gamma_2 folded
    s_t = pk_ref[4:4 + H, 0:C]                  # (H, C), s_t[h,c]=1 iff c//Dh==h

    # ---- norm1 (affine folded) + fused q|k|v projection (2 MXU pushes total)
    w_qkv = wqkv_ref[...]
    qkv_x = jnp.dot(_layer_norm_unit(x2), w_qkv,
                    preferred_element_type=f32) + b_qkv          # (Bb*N, 3C)
    qkv_c = jnp.dot(_layer_norm_unit(xc), w_qkv,
                    preferred_element_type=f32) + b_qkv          # (Bb, 3C)

    q_c = qkv_c[:, 0:C]                                          # (Bb, C) scale folded
    k_c = qkv_c[:, C:2 * C]                                      # (Bb, C)
    v_c = qkv_c[:, 2 * C:3 * C]                                  # (Bb, C)
    k_x = qkv_x[:, C:2 * C].reshape(Bb, N, C)                    # (Bb, N, C)
    v_x = qkv_x[:, 2 * C:3 * C].reshape(Bb, N, C)                # (Bb, N, C)

    # ---- per-head scores, computed directly in head-major (attn_o) layout
    q_h = q_c[:, None, :] * s_t[None, :, :]                      # (Bb, H, C)
    s_x = jnp.einsum('bhc,bnc->bhn', q_h, k_x,
                     preferred_element_type=f32)                 # (Bb, H, N)
    s_c = jnp.sum(q_h * k_c[:, None, :], axis=-1, keepdims=True) # (Bb, H, 1)

    # attn_o = (q*scale) @ k^T (pre-softmax, matching the reference module),
    # keys ordered [cls, x_0..x_{N-1}], written in its final layout.
    attn_ref[:, :, 0, 0:1] = s_c
    attn_ref[:, :, 0, 1:] = s_x

    # ---- softmax over the N+1 keys (exact divide; attn_drop identity in eval)
    m = jnp.maximum(jnp.max(s_x, axis=-1, keepdims=True), s_c)
    e_c = jnp.exp(s_c - m)
    e_x = jnp.exp(s_x - m)
    denom = jnp.sum(e_x, axis=-1, keepdims=True) + e_c
    p_c = e_c / denom                                            # (Bb, H, 1)
    p_x = e_x / denom                                            # (Bb, H, N)

    # ---- attn @ v for every head, then pick head h(c) per feature (head concat)
    o_h = jnp.einsum('bhn,bnc->bhc', p_x, v_x,
                     preferred_element_type=f32)                 # (Bb, H, C)
    o_h = o_h + p_c * v_c[:, None, :]                            # add cls key
    o = jnp.sum(o_h * s_t[None, :, :], axis=1)                   # (Bb, C)

    # ---- output projection (gamma_1 folded) + residual 1 (drop_path identity)
    xc = xc + jnp.dot(o, wproj_ref[...], preferred_element_type=f32) + b_proj

    # ---- Mlp on the cls token (norm2 folded into fc1, gamma_2 into fc2) + residual 2
    h1 = jnp.dot(_layer_norm_unit(xc), wfc1_ref[...],
                 preferred_element_type=f32) + b_fc1
    h1 = _gelu_erf(h1)
    h2 = jnp.dot(h1, wfc2_ref[...], preferred_element_type=f32) + b_fc2
    ycls_ref[:, 0, :] = xc + h2


# ---------------------------------------------------------------------------
# Wrapper
# ---------------------------------------------------------------------------
def _tensorcores_per_chip():
    try:
        kind = jax.devices()[0].device_kind.lower()
    except Exception:
        return 1
    # v7x has 2 TensorCores per chip; v5e / v6e have 1.
    return 2 if ("v7" in kind or "7x" in kind) else 1


def block_ca_forward(x, x_cls, p, num_heads):
    """x: (B, N, C) patch tokens, x_cls: (B, 1, C) cls token.

    Returns (x_cls_out (B,1,C), attn_o (B,H,1,N+1)) like Block_CA.forward.
    `p` holds the packed/folded parameters from pack_block_ca_params.
    """
    B, N, C = x.shape
    H = num_heads
    hidden = p["w_fc1"].shape[1]

    # Grid: batch-parallel on dual-TC v7x, single fused step on v5e / v6e so
    # the whole batch shares one pipeline step (no per-step fixed overhead).
    cores = _tensorcores_per_chip()
    grid_b = cores if (cores > 1 and B % cores == 0) else 1
    Bb = B // grid_b

    def fixed(shape):                      # weights shared across grid steps
        nd = len(shape)
        return pl.BlockSpec(shape, lambda b, _nd=nd: (0,) * _nd)

    in_specs = [
        pl.BlockSpec((Bb, N, C), lambda b: (b, 0, 0)),        # x
        pl.BlockSpec((Bb, 1, C), lambda b: (b, 0, 0)),        # x_cls
        fixed((C, 3 * C)),                                    # fused w_{q|k|v}
        fixed((C, C)),                                        # w_proj (gamma_1 folded)
        fixed((C, hidden)),                                   # w_fc1 (norm2 folded)
        fixed((hidden, C)),                                   # w_fc2 (gamma_2 folded)
        fixed(p["pk"].shape),                                 # packed biases + S_T
    ]
    out_specs = (
        pl.BlockSpec((Bb, 1, C), lambda b: (b, 0, 0)),        # x_cls out
        pl.BlockSpec((Bb, H, 1, N + 1), lambda b: (b, 0, 0, 0)),  # attn_o (final layout)
    )
    out_shape = (
        jax.ShapeDtypeStruct((B, 1, C), jnp.float32),
        jax.ShapeDtypeStruct((B, H, 1, N + 1), jnp.float32),
    )

    return pl.pallas_call(
        _block_ca_kernel,
        grid=(grid_b,),
        in_specs=in_specs,
        out_specs=out_specs,
        out_shape=out_shape,
        compiler_params=pltpu.CompilerParams(dimension_semantics=("parallel",)),
    )(x, x_cls, p["w_qkv"], p["w_proj"], p["w_fc1"], p["w_fc2"], p["pk"])


# ---------------------------------------------------------------------------
# Parameters: raw (PyTorch-layout, deterministic synthetic) + one-time fold/pack
# ---------------------------------------------------------------------------
def init_raw_params(key, dim, num_heads, mlp_ratio=4.0, init_values=1e-4):
    """Raw Block_CA parameters. Linear weights are stored as (in, out) = W.T."""
    hidden = int(dim * mlp_ratio)
    ks = jax.random.split(key, 13)
    std = 0.05
    return {
        "n1_w": 1.0 + 0.1 * jax.random.normal(ks[9], (dim,), jnp.float32),
        "n1_b": 0.1 * jax.random.normal(ks[10], (dim,), jnp.float32),
        # qkv_bias=False -> no q/k/v biases in the reference module.
        "w_q": std * jax.random.normal(ks[0], (dim, dim), jnp.float32),
        "w_k": std * jax.random.normal(ks[1], (dim, dim), jnp.float32),
        "w_v": std * jax.random.normal(ks[2], (dim, dim), jnp.float32),
        "w_proj": std * jax.random.normal(ks[3], (dim, dim), jnp.float32),
        "b_proj": 0.01 * jax.random.normal(ks[4], (dim,), jnp.float32),
        "gamma_1": init_values * jnp.ones((dim,), jnp.float32),
        "n2_w": 1.0 + 0.1 * jax.random.normal(ks[11], (dim,), jnp.float32),
        "n2_b": 0.1 * jax.random.normal(ks[12], (dim,), jnp.float32),
        "w_fc1": std * jax.random.normal(ks[5], (dim, hidden), jnp.float32),
        "b_fc1": 0.01 * jax.random.normal(ks[6], (hidden,), jnp.float32),
        "w_fc2": std * jax.random.normal(ks[7], (hidden, dim), jnp.float32),
        "b_fc2": 0.01 * jax.random.normal(ks[8], (dim,), jnp.float32),
        "gamma_2": init_values * jnp.ones((dim,), jnp.float32),
    }


def pack_block_ca_params(rp, num_heads):
    """One-time (init-time) folding + packing of the raw parameters."""
    C = rp["w_q"].shape[0]
    hidden = rp["w_fc1"].shape[1]
    dh = C // num_heads
    scale = dh ** (-0.5)

    # Fused q|k|v with the attention scale and the norm1 affine folded in.
    w_qkv_raw = jnp.concatenate([rp["w_q"] * scale, rp["w_k"], rp["w_v"]], axis=1)
    w_qkv = rp["n1_w"][:, None] * w_qkv_raw                 # (C, 3C)
    b_qkv = rp["n1_b"] @ w_qkv_raw                          # (3C,)
    # gamma_1 folded into the output projection.
    w_proj = rp["w_proj"] * rp["gamma_1"][None, :]
    b_proj = rp["gamma_1"] * rp["b_proj"]
    # norm2 affine folded into fc1, gamma_2 into fc2.
    w_fc1 = rp["n2_w"][:, None] * rp["w_fc1"]
    b_fc1 = rp["b_fc1"] + rp["n2_b"] @ rp["w_fc1"]
    w_fc2 = rp["w_fc2"] * rp["gamma_2"][None, :]
    b_fc2 = rp["gamma_2"] * rp["b_fc2"]

    # Head-selector: s_t[h, c] = 1 iff feature c belongs to head h.
    s_t = (jnp.arange(C)[None, :] // dh ==
           jnp.arange(num_heads)[:, None]).astype(jnp.float32)

    # Pack the 4 folded biases + S_T into one small operand.
    bw = max(3 * C, hidden)

    def row(v):
        v = v.reshape(1, -1)
        return jnp.pad(v, ((0, 0), (0, bw - v.shape[1])))

    pk = jnp.concatenate(
        [row(b_qkv), row(b_proj), row(b_fc1), row(b_fc2),
         jnp.pad(s_t, ((0, 0), (0, bw - C)))], axis=0)      # (4+H, bw)

    return {"w_qkv": w_qkv, "w_proj": w_proj, "w_fc1": w_fc1,
            "w_fc2": w_fc2, "pk": pk}


# ---------------------------------------------------------------------------
# Pure-JAX reference (mirrors the PyTorch module with the RAW parameters)
# ---------------------------------------------------------------------------
def block_ca_reference(x, x_cls, rp, num_heads):
    B, N, C = x.shape
    H = num_heads
    dh = C // H
    scale = dh ** (-0.5)

    def ln(v, w, b):
        mu = jnp.mean(v, -1, keepdims=True)
        var = jnp.mean((v - mu) ** 2, -1, keepdims=True)
        return (v - mu) / jnp.sqrt(var + 1e-5) * w + b

    u = jnp.concatenate([x_cls, x], axis=1)                      # (B, N+1, C)
    un = ln(u, rp["n1_w"], rp["n1_b"])
    q = (un[:, 0] @ rp["w_q"]).reshape(B, 1, H, dh).transpose(0, 2, 1, 3) * scale
    k = (un @ rp["w_k"]).reshape(B, N + 1, H, dh).transpose(0, 2, 1, 3)
    v = (un @ rp["w_v"]).reshape(B, N + 1, H, dh).transpose(0, 2, 1, 3)
    attn = q @ jnp.swapaxes(k, -2, -1)                           # (B, H, 1, N+1)
    attn_o = attn
    p = jax.nn.softmax(attn, axis=-1)
    o = (p @ v).transpose(0, 2, 1, 3).reshape(B, 1, C)
    o = o @ rp["w_proj"] + rp["b_proj"]
    x_cls = x_cls + rp["gamma_1"] * o
    xn = ln(x_cls, rp["n2_w"], rp["n2_b"])
    h = jax.nn.gelu(xn @ rp["w_fc1"] + rp["b_fc1"], approximate=False)
    m = h @ rp["w_fc2"] + rp["b_fc2"]
    x_cls = x_cls + rp["gamma_2"] * m
    return x_cls, attn_o


# ---------------------------------------------------------------------------
if __name__ == "__main__":
    key = jax.random.PRNGKey(0)

    # Block_CA hyper-parameters (drop / attn_drop / drop_path -> identity in eval)
    dim = 32
    num_heads = 4          # head_dim = 8
    mlp_ratio = 4.0        # mlp hidden = 128
    B, N = 2, 16           # batch=2, 16 patch tokens (+1 cls token)

    kp, kx, kc = jax.random.split(key, 3)
    raw_params = init_raw_params(kp, dim, num_heads, mlp_ratio)
    packed_params = pack_block_ca_params(raw_params, num_heads)   # one-time fold/pack

    x = jax.random.normal(kx, (B, N, dim), jnp.float32)
    x_cls = jax.random.normal(kc, (B, 1, dim), jnp.float32)

    fwd = jax.jit(functools.partial(block_ca_forward, num_heads=num_heads))
    y_cls, attn_o = fwd(x, x_cls, packed_params)
    jax.block_until_ready(y_cls)
    jax.block_until_ready(attn_o)

    assert y_cls.shape == (B, 1, dim)
    assert attn_o.shape == (B, num_heads, 1, N + 1)
    assert bool(jnp.all(jnp.isfinite(y_cls)))
    assert bool(jnp.all(jnp.isfinite(attn_o)))

    # Validate against the pure-JAX reference built from the unfolded params.
    y_ref, a_ref = block_ca_reference(x, x_cls, raw_params, num_heads)
    err_y = float(jnp.max(jnp.abs(y_cls - y_ref)))
    err_a = float(jnp.max(jnp.abs(attn_o - a_ref)))
    assert jnp.allclose(y_cls, y_ref, atol=2e-3, rtol=2e-3), err_y
    assert jnp.allclose(attn_o, a_ref, atol=2e-3, rtol=2e-3), err_a

    print("KERNEL_OK")
</pallas_src>

<mosaic_0001>
module attributes {stable_mosaic.version = 11 : i64} {
  func.func @_block_ca_kernel(%arg0: i32, %arg1: memref<2x16x32xf32, #tpu.memory_space<vmem>>, %arg2: memref<2x1x32xf32, #tpu.memory_space<vmem>>, %arg3: memref<32x96xf32, #tpu.memory_space<vmem>>, %arg4: memref<32x32xf32, #tpu.memory_space<vmem>>, %arg5: memref<32x128xf32, #tpu.memory_space<vmem>>, %arg6: memref<128x32xf32, #tpu.memory_space<vmem>>, %arg7: memref<8x128xf32, #tpu.memory_space<vmem>>, %arg8: memref<2x1x32xf32, #tpu.memory_space<vmem>>, %arg9: memref<2x4x1x17xf32, #tpu.memory_space<vmem>>) attributes {dimension_semantics = [#tpu.dimension_semantics<parallel>], iteration_bounds = array<i64: 1>, scalar_prefetch = 0 : i64, scratch_operands = 0 : i64, tpu.core_type = #tpu.core_type<tc>, window_params = [{transform_indices = @transform_0, window_bounds = array<i64: 2, 16, 32>}, {transform_indices = @transform_1, window_bounds = array<i64: 2, 1, 32>}, {pipeline_mode = #tpu.pipeline_mode<synchronous>, transform_indices = @transform_2, window_bounds = array<i64: 32, 96>}, {pipeline_mode = #tpu.pipeline_mode<synchronous>, transform_indices = @transform_3, window_bounds = array<i64: 32, 32>}, {pipeline_mode = #tpu.pipeline_mode<synchronous>, transform_indices = @transform_4, window_bounds = array<i64: 32, 128>}, {pipeline_mode = #tpu.pipeline_mode<synchronous>, transform_indices = @transform_5, window_bounds = array<i64: 128, 32>}, {pipeline_mode = #tpu.pipeline_mode<synchronous>, transform_indices = @transform_6, window_bounds = array<i64: 8, 128>}, {transform_indices = @transform_7, window_bounds = array<i64: 2, 1, 32>}, {transform_indices = @transform_8, window_bounds = array<i64: 2, 4, 1, 17>}]} {
    %c0 = arith.constant 0 : index
    %c0_0 = arith.constant 0 : index
    %c0_1 = arith.constant 0 : index
    %0 = vector.load %arg1[%c0, %c0_0, %c0_1] : memref<2x16x32xf32, #tpu.memory_space<vmem>>, vector<2x16x32xf32>
    %1 = vector.shape_cast %0 : vector<2x16x32xf32> to vector<32x32xf32>
    %c0_2 = arith.constant 0 : index
    %c0_3 = arith.constant 0 : index
    %c0_4 = arith.constant 0 : index
    %2 = vector.load %arg2[%c0_2, %c0_3, %c0_4] : memref<2x1x32xf32, #tpu.memory_space<vmem>>, vector<2x1x32xf32>
    %3 = vector.shape_cast %2 : vector<2x1x32xf32> to vector<2x32xf32>
    %c0_5 = arith.constant 0 : index
    %c0_6 = arith.constant 0 : index
    %4 = vector.load %arg7[%c0_5, %c0_6] : memref<8x128xf32, #tpu.memory_space<vmem>>, vector<1x96xf32>
    %c1 = arith.constant 1 : index
    %c0_7 = arith.constant 0 : index
    %5 = vector.load %arg7[%c1, %c0_7] : memref<8x128xf32, #tpu.memory_space<vmem>>, vector<1x32xf32>
    %c2 = arith.constant 2 : index
    %c0_8 = arith.constant 0 : index
    %6 = vector.load %arg7[%c2, %c0_8] : memref<8x128xf32, #tpu.memory_space<vmem>>, vector<1x128xf32>
    %c3 = arith.constant 3 : index
    %c0_9 = arith.constant 0 : index
    %7 = vector.load %arg7[%c3, %c0_9] : memref<8x128xf32, #tpu.memory_space<vmem>>, vector<1x32xf32>
    %c4 = arith.constant 4 : index
    %c0_10 = arith.constant 0 : index
    %8 = vector.load %arg7[%c4, %c0_10] : memref<8x128xf32, #tpu.memory_space<vmem>>, vector<4x32xf32>
    %c0_11 = arith.constant 0 : index
    %c0_12 = arith.constant 0 : index
    %9 = vector.load %arg3[%c0_11, %c0_12] : memref<32x96xf32, #tpu.memory_space<vmem>>, vector<32x96xf32>
    %cst = arith.constant dense<0.000000e+00> : vector<32xf32>
    %10 = vector.multi_reduction <add>, %1, %cst [1] : vector<32x32xf32> to vector<32xf32>
    %11 = vector.shape_cast %10 : vector<32xf32> to vector<32x1xf32>
    %cst_13 = arith.constant 3.200000e+01 : f32
    %12 = vector.broadcast %cst_13 : f32 to vector<32x1xf32>
    %13 = arith.divf %11, %12 : vector<32x1xf32>
    %14 = vector.broadcast %13 : vector<32x1xf32> to vector<32x32xf32>
    %15 = arith.subf %1, %14 : vector<32x32xf32>
    %16 = arith.mulf %15, %15 : vector<32x32xf32>
    %cst_14 = arith.constant dense<0.000000e+00> : vector<32xf32>
    %17 = vector.multi_reduction <add>, %16, %cst_14 [1] : vector<32x32xf32> to vector<32xf32>
    %18 = vector.shape_cast %17 : vector<32xf32> to vector<32x1xf32>
    %cst_15 = arith.constant 3.200000e+01 : f32
    %19 = vector.broadcast %cst_15 : f32 to vector<32x1xf32>
    %20 = arith.divf %18, %19 : vector<32x1xf32>
    %21 = vector.broadcast %13 : vector<32x1xf32> to vector<32x32xf32>
    %22 = arith.subf %1, %21 : vector<32x32xf32>
    %cst_16 = arith.constant 9.99999974E-6 : f32
    %23 = vector.broadcast %cst_16 : f32 to vector<32x1xf32>
    %24 = arith.addf %20, %23 : vector<32x1xf32>
    %25 = math.rsqrt %24 : vector<32x1xf32>
    %26 = vector.broadcast %25 : vector<32x1xf32> to vector<32x32xf32>
    %27 = arith.mulf %22, %26 : vector<32x32xf32>
    %cst_17 = arith.constant dense<0.000000e+00> : vector<32x96xf32>
    %28 = tpu.matmul %27, %9, %cst_17 {dimension_numbers = #tpu.dot_dimension_numbers<[1], [0], [0], [1], [0, 0, 1, 1], [], []>} : vector<32x32xf32>, vector<32x96xf32>, vector<32x96xf32> -> vector<32x96xf32>
    %29 = vector.broadcast %4 : vector<1x96xf32> to vector<32x96xf32>
    %30 = arith.addf %28, %29 : vector<32x96xf32>
    %cst_18 = arith.constant dense<0.000000e+00> : vector<2xf32>
    %31 = vector.multi_reduction <add>, %3, %cst_18 [1] : vector<2x32xf32> to vector<2xf32>
    %32 = vector.shape_cast %31 : vector<2xf32> to vector<2x1xf32>
    %cst_19 = arith.constant 3.200000e+01 : f32
    %33 = vector.broadcast %cst_19 : f32 to vector<2x1xf32>
    %34 = arith.divf %32, %33 : vector<2x1xf32>
    %35 = vector.broadcast %34 : vector<2x1xf32> to vector<2x32xf32>
    %36 = arith.subf %3, %35 : vector<2x32xf32>
    %37 = arith.mulf %36, %36 : vector<2x32xf32>
    %cst_20 = arith.constant dense<0.000000e+00> : vector<2xf32>
    %38 = vector.multi_reduction <add>, %37, %cst_20 [1] : vector<2x32xf32> to vector<2xf32>
    %39 = vector.shape_cast %38 : vector<2xf32> to vector<2x1xf32>
    %cst_21 = arith.constant 3.200000e+01 : f32
    %40 = vector.broadcast %cst_21 : f32 to vector<2x1xf32>
    %41 = arith.divf %39, %40 : vector<2x1xf32>
    %42 = vector.broadcast %34 : vector<2x1xf32> to vector<2x32xf32>
    %43 = arith.subf %3, %42 : vector<2x32xf32>
    %cst_22 = arith.constant 9.99999974E-6 : f32
    %44 = vector.broadcast %cst_22 : f32 to vector<2x1xf32>
    %45 = arith.addf %41, %44 : vector<2x1xf32>
    %46 = math.rsqrt %45 : vector<2x1xf32>
    %47 = vector.broadcast %46 : vector<2x1xf32> to vector<2x32xf32>
    %48 = arith.mulf %43, %47 : vector<2x32xf32>
    %cst_23 = arith.constant dense<0.000000e+00> : vector<2x96xf32>
    %49 = tpu.matmul %48, %9, %cst_23 {dimension_numbers = #tpu.dot_dimension_numbers<[1], [0], [0], [1], [0, 0, 1, 1], [], []>} : vector<2x32xf32>, vector<32x96xf32>, vector<2x96xf32> -> vector<2x96xf32>
    %50 = vector.broadcast %4 : vector<1x96xf32> to vector<2x96xf32>
    %51 = arith.addf %49, %50 : vector<2x96xf32>
    %52 = vector.extract_strided_slice %51 {offsets = [0, 0], sizes = [2, 32], strides = [1, 1]} : vector<2x96xf32> to vector<2x32xf32>
    %53 = vector.extract_strided_slice %51 {offsets = [0, 32], sizes = [2, 32], strides = [1, 1]} : vector<2x96xf32> to vector<2x32xf32>
    %54 = vector.extract_strided_slice %51 {offsets = [0, 64], sizes = [2, 32], strides = [1, 1]} : vector<2x96xf32> to vector<2x32xf32>
    %55 = vector.extract_strided_slice %30 {offsets = [0, 32], sizes = [32, 32], strides = [1, 1]} : vector<32x96xf32> to vector<32x32xf32>
    %56 = vector.shape_cast %55 : vector<32x32xf32> to vector<2x16x32xf32>
    %57 = vector.extract_strided_slice %30 {offsets = [0, 64], sizes = [32, 32], strides = [1, 1]} : vector<32x96xf32> to vector<32x32xf32>
    %58 = vector.shape_cast %57 : vector<32x32xf32> to vector<2x16x32xf32>
    %59 = vector.shape_cast %52 : vector<2x32xf32> to vector<2x1x32xf32>
    %60 = vector.shape_cast %8 : vector<4x32xf32> to vector<1x4x32xf32>
    %61 = vector.broadcast %59 : vector<2x1x32xf32> to vector<2x4x32xf32>
    %62 = vector.broadcast %60 : vector<1x4x32xf32> to vector<2x4x32xf32>
    %63 = arith.mulf %61, %62 : vector<2x4x32xf32>
    "tpu.trace_start"() <{level = 10 : i32, message = "bhc,bnc->bhn"}> : () -> ()
    %cst_24 = arith.constant dense<0.000000e+00> : vector<2x4x16xf32>
    %64 = tpu.matmul %63, %56, %cst_24 {dimension_numbers = #tpu.dot_dimension_numbers<[2], [2], [1], [1], [0, 0, 0, 1, 1, 1], [0], [0]>} : vector<2x4x32xf32>, vector<2x16x32xf32>, vector<2x4x16xf32> -> vector<2x4x16xf32>
    "tpu.trace_stop"() : () -> ()
    %65 = vector.shape_cast %53 : vector<2x32xf32> to vector<2x1x32xf32>
    %66 = vector.broadcast %65 : vector<2x1x32xf32> to vector<2x4x32xf32>
    %67 = arith.mulf %63, %66 : vector<2x4x32xf32>
    %cst_25 = arith.constant dense<0.000000e+00> : vector<2x4xf32>
    %68 = vector.multi_reduction <add>, %67, %cst_25 [2] : vector<2x4x32xf32> to vector<2x4xf32>
    %69 = vector.shape_cast %68 : vector<2x4xf32> to vector<2x4x1xf32>
    %c0_26 = arith.constant 0 : index
    %c0_27 = arith.constant 0 : index
    %c0_28 = arith.constant 0 : index
    %c0_29 = arith.constant 0 : index
    %70 = vector.load %arg9[%c0_26, %c0_27, %c0_28, %c0_29] : memref<2x4x1x17xf32, #tpu.memory_space<vmem>>, vector<2x4x1x1xf32>
    %71 = vector.shape_cast %70 : vector<2x4x1x1xf32> to vector<2x4x1xf32>
    %72 = vector.shape_cast %69 : vector<2x4x1xf32> to vector<2x4x1x1xf32>
    tpu.vector_store %arg9[%c0_26, %c0_27, %c0_28, %c0_29], %72 {strides = array<i32>} : memref<2x4x1x17xf32, #tpu.memory_space<vmem>>, vector<2x4x1x1xf32>,
    %c0_30 = arith.constant 0 : index
    %c0_31 = arith.constant 0 : index
    %c0_32 = arith.constant 0 : index
    %c1_33 = arith.constant 1 : index
    %73 = vector.load %arg9[%c0_30, %c0_31, %c0_32, %c1_33] : memref<2x4x1x17xf32, #tpu.memory_space<vmem>>, vector<2x4x1x16xf32>
    %74 = vector.shape_cast %73 : vector<2x4x1x16xf32> to vector<2x4x16xf32>
    %75 = vector.shape_cast %64 : vector<2x4x16xf32> to vector<2x4x1x16xf32>
    tpu.vector_store %arg9[%c0_30, %c0_31, %c0_32, %c1_33], %75 {strides = array<i32>} : memref<2x4x1x17xf32, #tpu.memory_space<vmem>>, vector<2x4x1x16xf32>,
    %cst_34 = arith.constant dense<0xFF800000> : vector<2x4xf32>
    %76 = vector.multi_reduction <maximumf>, %64, %cst_34 [2] : vector<2x4x16xf32> to vector<2x4xf32>
    %77 = vector.shape_cast %76 : vector<2x4xf32> to vector<2x4x1xf32>
    %78 = arith.maximumf %77, %69 : vector<2x4x1xf32>
    %79 = arith.subf %69, %78 : vector<2x4x1xf32>
    %80 = math.exp %79 : vector<2x4x1xf32>
    %81 = vector.broadcast %78 : vector<2x4x1xf32> to vector<2x4x16xf32>
    %82 = arith.subf %64, %81 : vector<2x4x16xf32>
    %83 = math.exp %82 : vector<2x4x16xf32>
    %cst_35 = arith.constant dense<0.000000e+00> : vector<2x4xf32>
    %84 = vector.multi_reduction <add>, %83, %cst_35 [2] : vector<2x4x16xf32> to vector<2x4xf32>
    %85 = vector.shape_cast %84 : vector<2x4xf32> to vector<2x4x1xf32>
    %86 = arith.addf %85, %80 : vector<2x4x1xf32>
    %87 = arith.divf %80, %86 : vector<2x4x1xf32>
    %88 = vector.broadcast %86 : vector<2x4x1xf32> to vector<2x4x16xf32>
    %89 = arith.divf %83, %88 : vector<2x4x16xf32>
    "tpu.trace_start"() <{level = 10 : i32, message = "bhn,bnc->bhc"}> : () -> ()
    %cst_36 = arith.constant dense<0.000000e+00> : vector<2x4x32xf32>
    %90 = tpu.matmul %89, %58, %cst_36 {dimension_numbers = #tpu.dot_dimension_numbers<[2], [1], [1], [2], [0, 0, 0, 1, 1, 2], [0], [0]>} : vector<2x4x16xf32>, vector<2x16x32xf32>, vector<2x4x32xf32> -> vector<2x4x32xf32>
    "tpu.trace_stop"() : () -> ()
    %91 = vector.shape_cast %54 : vector<2x32xf32> to vector<2x1x32xf32>
    %92 = vector.broadcast %87 : vector<2x4x1xf32> to vector<2x4x32xf32>
    %93 = vector.broadcast %91 : vector<2x1x32xf32> to vector<2x4x32xf32>
    %94 = arith.mulf %92, %93 : vector<2x4x32xf32>
    %95 = arith.addf %90, %94 : vector<2x4x32xf32>
    %96 = vector.shape_cast %8 : vector<4x32xf32> to vector<1x4x32xf32>
    %97 = vector.broadcast %96 : vector<1x4x32xf32> to vector<2x4x32xf32>
    %98 = arith.mulf %95, %97 : vector<2x4x32xf32>
    %cst_37 = arith.constant dense<0.000000e+00> : vector<2x32xf32>
    %99 = vector.multi_reduction <add>, %98, %cst_37 [1] : vector<2x4x32xf32> to vector<2x32xf32>
    %c0_38 = arith.constant 0 : index
    %c0_39 = arith.constant 0 : index
    %100 = vector.load %arg4[%c0_38, %c0_39] : memref<32x32xf32, #tpu.memory_space<vmem>>, vector<32x32xf32>
    %cst_40 = arith.constant dense<0.000000e+00> : vector<2x32xf32>
    %101 = tpu.matmul %99, %100, %cst_40 {dimension_numbers = #tpu.dot_dimension_numbers<[1], [0], [0], [1], [0, 0, 1, 1], [], []>} : vector<2x32xf32>, vector<32x32xf32>, vector<2x32xf32> -> vector<2x32xf32>
    %102 = arith.addf %3, %101 : vector<2x32xf32>
    %103 = vector.broadcast %5 : vector<1x32xf32> to vector<2x32xf32>
    %104 = arith.addf %102, %103 : vector<2x32xf32>
    %cst_41 = arith.constant dense<0.000000e+00> : vector<2xf32>
    %105 = vector.multi_reduction <add>, %104, %cst_41 [1] : vector<2x32xf32> to vector<2xf32>
    %106 = vector.shape_cast %105 : vector<2xf32> to vector<2x1xf32>
    %cst_42 = arith.constant 3.200000e+01 : f32
    %107 = vector.broadcast %cst_42 : f32 to vector<2x1xf32>
    %108 = arith.divf %106, %107 : vector<2x1xf32>
    %109 = vector.broadcast %108 : vector<2x1xf32> to vector<2x32xf32>
    %110 = arith.subf %104, %109 : vector<2x32xf32>
    %111 = arith.mulf %110, %110 : vector<2x32xf32>
    %cst_43 = arith.constant dense<0.000000e+00> : vector<2xf32>
    %112 = vector.multi_reduction <add>, %111, %cst_43 [1] : vector<2x32xf32> to vector<2xf32>
    %113 = vector.shape_cast %112 : vector<2xf32> to vector<2x1xf32>
    %cst_44 = arith.constant 3.200000e+01 : f32
    %114 = vector.broadcast %cst_44 : f32 to vector<2x1xf32>
    %115 = arith.divf %113, %114 : vector<2x1xf32>
    %116 = vector.broadcast %108 : vector<2x1xf32> to vector<2x32xf32>
    %117 = arith.subf %104, %116 : vector<2x32xf32>
    %cst_45 = arith.constant 9.99999974E-6 : f32
    %118 = vector.broadcast %cst_45 : f32 to vector<2x1xf32>
    %119 = arith.addf %115, %118 : vector<2x1xf32>
    %120 = math.rsqrt %119 : vector<2x1xf32>
    %121 = vector.broadcast %120 : vector<2x1xf32> to vector<2x32xf32>
    %122 = arith.mulf %117, %121 : vector<2x32xf32>
    %c0_46 = arith.constant 0 : index
    %c0_47 = arith.constant 0 : index
    %123 = vector.load %arg5[%c0_46, %c0_47] : memref<32x128xf32, #tpu.memory_space<vmem>>, vector<32x128xf32>
    %cst_48 = arith.constant dense<0.000000e+00> : vector<2x128xf32>
    %124 = tpu.matmul %122, %123, %cst_48 {dimension_numbers = #tpu.dot_dimension_numbers<[1], [0], [0], [1], [0, 0, 1, 1], [], []>} : vector<2x32xf32>, vector<32x128xf32>, vector<2x128xf32> -> vector<2x128xf32>
    %125 = vector.broadcast %6 : vector<1x128xf32> to vector<2x128xf32>
    %126 = arith.addf %124, %125 : vector<2x128xf32>
    %cst_49 = arith.constant 0.707106769 : f32
    %127 = vector.broadcast %cst_49 : f32 to vector<2x128xf32>
    %128 = arith.mulf %126, %127 : vector<2x128xf32>
    %129 = math.absf %128 : vector<2x128xf32>
    %cst_50 = arith.constant 0.327591091 : f32
    %130 = vector.broadcast %cst_50 : f32 to vector<2x128xf32>
    %131 = arith.mulf %130, %129 : vector<2x128xf32>
    %cst_51 = arith.constant 1.000000e+00 : f32
    %132 = vector.broadcast %cst_51 : f32 to vector<2x128xf32>
    %133 = arith.addf %132, %131 : vector<2x128xf32>
    %cst_52 = arith.constant 1.000000e+00 : f32
    %134 = vector.broadcast %cst_52 : f32 to vector<2x128xf32>
    %135 = arith.divf %134, %133 : vector<2x128xf32>
    %cst_53 = arith.constant 1.06140542 : f32
    %136 = vector.broadcast %cst_53 : f32 to vector<2x128xf32>
    %137 = arith.mulf %136, %135 : vector<2x128xf32>
    %cst_54 = arith.constant 1.45315206 : f32
    %138 = vector.broadcast %cst_54 : f32 to vector<2x128xf32>
    %139 = arith.subf %137, %138 : vector<2x128xf32>
    %140 = arith.mulf %139, %135 : vector<2x128xf32>
    %cst_55 = arith.constant 1.42141378 : f32
    %141 = vector.broadcast %cst_55 : f32 to vector<2x128xf32>
    %142 = arith.addf %140, %141 : vector<2x128xf32>
    %143 = arith.mulf %142, %135 : vector<2x128xf32>
    %cst_56 = arith.constant 0.284496725 : f32
    %144 = vector.broadcast %cst_56 : f32 to vector<2x128xf32>
    %145 = arith.subf %143, %144 : vector<2x128xf32>
    %146 = arith.mulf %145, %135 : vector<2x128xf32>
    %cst_57 = arith.constant 0.254829586 : f32
    %147 = vector.broadcast %cst_57 : f32 to vector<2x128xf32>
    %148 = arith.addf %146, %147 : vector<2x128xf32>
    %149 = arith.mulf %148, %135 : vector<2x128xf32>
    %cst_58 = arith.constant 0.000000e+00 : f32
    %150 = vector.broadcast %cst_58 : f32 to vector<2x128xf32>
    %151 = arith.subf %150, %129 : vector<2x128xf32>
    %152 = arith.mulf %151, %129 : vector<2x128xf32>
    %153 = math.exp %152 : vector<2x128xf32>
    %154 = arith.mulf %149, %153 : vector<2x128xf32>
    %cst_59 = arith.constant 1.000000e+00 : f32
    %155 = vector.broadcast %cst_59 : f32 to vector<2x128xf32>
    %156 = arith.subf %155, %154 : vector<2x128xf32>
    %cst_60 = arith.constant 0.000000e+00 : f32
    %157 = vector.broadcast %cst_60 : f32 to vector<2x128xf32>
    %158 = arith.cmpf oge, %128, %157 : vector<2x128xf32>
    %cst_61 = arith.constant 0.000000e+00 : f32
    %159 = vector.broadcast %cst_61 : f32 to vector<2x128xf32>
    %160 = arith.subf %159, %156 : vector<2x128xf32>
    %161 = arith.select %158, %156, %160 : vector<2x128xi1>, vector<2x128xf32>
    %cst_62 = arith.constant 5.000000e-01 : f32
    %162 = vector.broadcast %cst_62 : f32 to vector<2x128xf32>
    %163 = arith.mulf %162, %126 : vector<2x128xf32>
    %cst_63 = arith.constant 1.000000e+00 : f32
    %164 = vector.broadcast %cst_63 : f32 to vector<2x128xf32>
    %165 = arith.addf %164, %161 : vector<2x128xf32>
    %166 = arith.mulf %163, %165 : vector<2x128xf32>
    %c0_64 = arith.constant 0 : index
    %c0_65 = arith.constant 0 : index
    %167 = vector.load %arg6[%c0_64, %c0_65] : memref<128x32xf32, #tpu.memory_space<vmem>>, vector<128x32xf32>
    %cst_66 = arith.constant dense<0.000000e+00> : vector<2x32xf32>
    %168 = tpu.matmul %166, %167, %cst_66 {dimension_numbers = #tpu.dot_dimension_numbers<[1], [0], [0], [1], [0, 0, 1, 1], [], []>} : vector<2x128xf32>, vector<128x32xf32>, vector<2x32xf32> -> vector<2x32xf32>
    %169 = vector.broadcast %7 : vector<1x32xf32> to vector<2x32xf32>
    %170 = arith.addf %168, %169 : vector<2x32xf32>
    %171 = arith.addf %104, %170 : vector<2x32xf32>
    %c0_67 = arith.constant 0 : index
    %c0_68 = arith.constant 0 : index
    %c0_69 = arith.constant 0 : index
    %172 = vector.load %arg8[%c0_67, %c0_68, %c0_69] : memref<2x1x32xf32, #tpu.memory_space<vmem>>, vector<2x1x32xf32>
    %173 = vector.shape_cast %172 : vector<2x1x32xf32> to vector<2x32xf32>
    %174 = vector.shape_cast %171 : vector<2x32xf32> to vector<2x1x32xf32>
    tpu.vector_store %arg8[%c0_67, %c0_68, %c0_69], %174 {strides = array<i32>} : memref<2x1x32xf32, #tpu.memory_space<vmem>>, vector<2x1x32xf32>,
    return
  }
  func.func @transform_0(%arg0: i32) -> (i32, i32, i32) {
    %c0_i32 = arith.constant 0 : i32
    %c0_i32_0 = arith.constant 0 : i32
    %c0_i32_1 = arith.constant 0 : i32
    return %arg0, %c0_i32, %c0_i32_0 : i32, i32, i32
  }
  func.func @transform_1(%arg0: i32) -> (i32, i32, i32) {
    %c0_i32 = arith.constant 0 : i32
    %c0_i32_0 = arith.constant 0 : i32
    %c0_i32_1 = arith.constant 0 : i32
    return %arg0, %c0_i32, %c0_i32_0 : i32, i32, i32
  }
  func.func @transform_2(%arg0: i32) -> (i32, i32) {
    %c0_i32 = arith.constant 0 : i32
    %c0_i32_0 = arith.constant 0 : i32
    %c0_i32_1 = arith.constant 0 : i32
    return %c0_i32, %c0_i32_0 : i32, i32
  }
  func.func @transform_3(%arg0: i32) -> (i32, i32) {
    %c0_i32 = arith.constant 0 : i32
    %c0_i32_0 = arith.constant 0 : i32
    %c0_i32_1 = arith.constant 0 : i32
    return %c0_i32, %c0_i32_0 : i32, i32
  }
  func.func @transform_4(%arg0: i32) -> (i32, i32) {
    %c0_i32 = arith.constant 0 : i32
    %c0_i32_0 = arith.constant 0 : i32
    %c0_i32_1 = arith.constant 0 : i32
    return %c0_i32, %c0_i32_0 : i32, i32
  }
  func.func @transform_5(%arg0: i32) -> (i32, i32) {
    %c0_i32 = arith.constant 0 : i32
    %c0_i32_0 = arith.constant 0 : i32
    %c0_i32_1 = arith.constant 0 : i32
    return %c0_i32, %c0_i32_0 : i32, i32
  }
  func.func @transform_6(%arg0: i32) -> (i32, i32) {
    %c0_i32 = arith.constant 0 : i32
    %c0_i32_0 = arith.constant 0 : i32
    %c0_i32_1 = arith.constant 0 : i32
    return %c0_i32, %c0_i32_0 : i32, i32
  }
  func.func @transform_7(%arg0: i32) -> (i32, i32, i32) {
    %c0_i32 = arith.constant 0 : i32
    %c0_i32_0 = arith.constant 0 : i32
    %c0_i32_1 = arith.constant 0 : i32
    return %arg0, %c0_i32, %c0_i32_0 : i32, i32, i32
  }
  func.func @transform_8(%arg0: i32) -> (i32, i32, i32, i32) {
    %c0_i32 = arith.constant 0 : i32
    %c0_i32_0 = arith.constant 0 : i32
    %c0_i32_1 = arith.constant 0 : i32
    %c0_i32_2 = arith.constant 0 : i32
    return %arg0, %c0_i32, %c0_i32_0, %c0_i32_1 : i32, i32, i32, i32
  }
}

</mosaic_0001>

<bundles_post_ra>
// kernel: block_ca_forward.1
= control target key start
LH: loop header
LB: loop body
LE: loop exit
PB: predicated region body
PF: predicated region fallthrough
CT: control target
= control target key end

     0   :  { %14 = vsyncpa [#allocation3], 0  ;;  %vm45_vm0 = vcmask 261120   ;;  %v206_v3 = vlaneseq  ;;  %v1807_v8 = vmov 1966171168   ;;  %s2251_s0 = inlined_call_operand.vmem [shape: f32[2,16,32], index: 0, kind: input, shape index: {}]   ;;  %s2252_s1 = inlined_call_operand.vmem [shape: f32[2,1,32], index: 1, kind: input, shape index: {}]   ;;  %s2253_s2 = inlined_call_operand.vmem [shape: f32[32,96], index: 2, kind: input, shape index: {}]   ;;  %s2254_s3 = inlined_call_operand.vmem [shape: f32[32,32], index: 3, kind: input, shape index: {}]   ;;  %s2255_s4 = inlined_call_operand.vmem [shape: f32[32,128], index: 4, kind: input, shape index: {}]   ;;  %s2256_s5 = inlined_call_operand.vmem [shape: f32[128,32], index: 5, kind: input, shape index: {}]   ;;  %s2257_s6 = inlined_call_operand.vmem [shape: f32[8,128], index: 6, kind: input, shape index: {}]   ;;  %s2258_s7 = inlined_call_operand.hbm [shape: f32[2,1,32], index: 7, kind: output, shape index: {0}]   ;;  %s2259_s8 = inlined_call_operand.hbm [shape: f32[2,4,1,17], index: 8, kind: output, shape index: {1}]  }
   0x1   :  { %v30_v0 = vld [vmem:[%s2251_s0] sm:$0xff]  ;;  %v32_v1 = vld [vmem:[%s2251_s0 + $0x10] sm:$0xff]  ;;  %v31_v2 = vld [vmem:[%s2251_s0 + $0x8] sm:$0xff]  ;;  %v204_v9 = vunpack.c.l.s4 %v1807_v8 }
   0x2   :  { %v46_v4 = vsel %vm45_vm0, %v30_v0, 0.0  ;;  %v52_v5 = vsel %vm45_vm0, %v32_v1, 0.0  ;;  %v33_v6 = vld [vmem:[%s2251_s0 + $0x18] sm:$0xff]  ;;  %v1879_v7 = vld [vmem:[%s2252_s1] sm:$0x1]  ;;  %v1886_v11 = vshrl.u32 %v206_v3, 7 }
   0x3   :  { %47 = vadd.xlane.f32.xlu0 %v46_v4  ;;  %53 = vadd.xlane.f32.xlu1 %v52_v5  ;;  %v1884_v10 = vld [vmem:[%s2252_s1 + $0x1] sm:$0x1]  ;;  %v49_v12 = vsel %vm45_vm0, %v31_v2, 0.0  ;;  %v55_v13 = vsel %vm45_vm0, %v33_v6, 0.0  ;;  %v205_v15 = vunpack.c.0.s8 %v204_v9 }
   0x4   :  { %v202_v14 = vcombine.low %v1879_v7, %v1884_v10 }
   0x5   :  { %15 = vsyncpa [#allocation5], 0  ;;  %v1893_v16 = vsub.s32 %v205_v15, %v1886_v11  ;;  %vm218_vm1 = vcmask 254976   ;;  %v1912_v35 = vsub.s32 0, %v1886_v11  ;;  %v1915_v36 = vsub.s32 1, %v1886_v11  ;;  %v41_v54 = vld [vmem:[%s2253_s2] sm:$0xff] }
   0x6   :  { %v42_v55 = vld [vmem:[%s2253_s2 + $0x8] sm:$0xff]  ;;  %v43_v57 = vld [vmem:[%s2253_s2 + $0x10] sm:$0xff]  ;;  %v44_v58 = vld [vmem:[%s2253_s2 + $0x18] sm:$0xff]  ;;  %v1808_v60 = vmov 0.0|0.0   ;;  %vm1809_vm2 = vmmov 0   ;;  %v1810_v61 = vmov 0.0  }
   0x7   :  { %50 = vadd.xlane.f32.xlu0 %v49_v12  ;;  %56 = vadd.xlane.f32.xlu1 %v55_v13  ;;  %v209_v17 = vrot.slane %v202_v14, %v1893_v16  ;;  %v1637_v56 = vpack.c.bf16 %v42_v55, %v41_v54  ;;  %v1641_v59 = vpack.c.bf16 %v44_v58, %v43_v57  ;;  %s1811_s24 = smov 96   ;;  %vm1653_vm3 = vmpackc.low %vm45_vm0, %vm45_vm0  ;;  %vm573_vm4 = vcmask 257024   ;;  %s1812_s27 = smov 64  }
   0x8   :  { %1659 = vmatprep.subr.bf16.mxu0 %v1808_v60  ;;  %1570 = vmatprep.mubr.msk.f32.mxu0 %vm1809_vm2, %v1810_v61  ;;  %vm622_vm5 = vcmask 0   ;;  %vm746_vm6 = vcmask 125952   ;;  %vm793_vm7 = vcmask 130048   ;;  %vm972_vm8 = vcmask 1041409   ;;  %s1813_s15 = smov 1  }
   0x9   :  { %v216_v18 = vrot.slane %v209_v17, %v1893_v16  ;;  %1638 = vmatprep.subr.bf16.mxu1 %v1637_v56  ;;  %vm737_vm9 = vcmask 131080  }
   0xa   :  { %1640 = vmatpush3.bf16.msra.mxu1 %v1637_v56 }
   0xb   :  { %v219_v19 = vsel %vm218_vm1, %v216_v18, 0.0  ;;  %1642 = vmatprep.subr.bf16.mxu1 %v1641_v59 }
   0xc   :  { %220 = vadd.xlane.f32.xlu0 %v219_v19 }
   0xe   :  { %1644 = vmatpush3.bf16.msra.mxu1 %v1641_v59 }
   0xf   :  { %1645 = vmatprep.subr.bf16.mxu1 %v1808_v60 }
  0x90   :  { %v48_v20 = vpop.xlane.xlu0 %47  ;;  %v54_v21 = vpop.xlane.xlu1 %53 }
  0x91   :  { %v59_v22 = vmul.f32 0.03125, %v48_v20  ;;  %v61_v23 = vmul.f32 0.03125, %v54_v21 }
  0x93   :  { %v1898_v24 = vsub.f32 %v30_v0, %v59_v22  ;;  %v1900_v25 = vsub.f32 %v32_v1, %v61_v23 }
  0x94   :  { %v51_v26 = vpop.xlane.xlu0 %50  ;;  %v57_v27 = vpop.xlane.xlu1 %56 }
  0x95   :  { %v60_v28 = vmul.f32 0.03125, %v51_v26  ;;  %v62_v29 = vmul.f32 0.03125, %v57_v27  ;;  %v67_v30 = vmul.f32 %v1898_v24, %v1898_v24  ;;  %v69_v31 = vmul.f32 %v1900_v25, %v1900_v25 }
  0x97   :  { %v1906_v32 = vsub.f32 %v31_v2, %v60_v28  ;;  %v1908_v33 = vsub.f32 %v33_v6, %v62_v29  ;;  %v71_v34 = vsel %vm45_vm0, %v67_v30, 0.0  ;;  %v77_v37 = vsel %vm45_vm0, %v69_v31, 0.0 }
  0x98   :  { %72 = vadd.xlane.f32.xlu1 %v71_v34 }
  0x99   :  { %v68_v38 = vmul.f32 %v1906_v32, %v1906_v32  ;;  %v70_v39 = vmul.f32 %v1908_v33, %v1908_v33  ;;  %v221_v40 = vpop.xlane.xlu0 %220 }
  0x9a   :  { %v222_v41 = vmul.f32 0.03125, %v221_v40 }
  0x9b   :  { %v74_v42 = vsel %vm45_vm0, %v68_v38, 0.0  ;;  %v80_v45 = vsel %vm45_vm0, %v70_v39, 0.0 }
  0x9c   :  { %78 = vadd.xlane.f32.xlu1 %v77_v37  ;;  %75 = vadd.xlane.f32.xlu0 %v74_v42  ;;  %v227_v43 = vrot.slane %v222_v41, %v1912_v35  ;;  %v231_v44 = vrot.slane %v222_v41, %v1915_v36 }
  0x9e   :  { %v1927_v46 = vsub.f32 %v1879_v7, %v227_v43  ;;  %v1930_v47 = vsub.f32 %v1884_v10, %v231_v44 }
  0xa0   :  { %81 = vadd.xlane.f32.xlu0 %v80_v45  ;;  %v236_v48 = vmul.f32 %v1927_v46, %v1927_v46  ;;  %v237_v49 = vmul.f32 %v1930_v47, %v1930_v47 }
  0xa2   :  { %v240_v50 = vcombine.low %v236_v48, %v237_v49 }
  0xa4   :  { %v247_v51 = vrot.slane %v240_v50, %v1893_v16 }
  0xa6   :  { %v254_v52 = vrot.slane %v247_v51, %v1893_v16 }
  0xa8   :  { %v256_v53 = vsel %vm218_vm1, %v254_v52, 0.0 }
  0xa9   :  { %257 = vadd.xlane.f32.xlu1 %v256_v53 }
 0x125   :  { %v73_v62 = vpop.xlane.xlu1 %72 }
 0x126   :  { %v83_v63 = vmul.f32 0.03125, %v73_v62  ;;  %v2002_v62 = vld [vmem:[%s2257_s6 + $0x4] sm:$0xf] }
 0x128   :  { %v87_v0 = vadd.f32 1e-05, %v83_v63 }
 0x129   :  { %v79_v1 = vpop.xlane.xlu1 %78  ;;  %v76_v2 = vpop.xlane.xlu0 %75 }
 0x12a   :  { %1731 = vrsqrt.f32 %v87_v0  ;;  %v85_v3 = vmul.f32 0.03125, %v79_v1  ;;  %v84_v4 = vmul.f32 0.03125, %v76_v2 }
 0x12c   :  { %v89_v5 = vadd.f32 1e-05, %v85_v3  ;;  %v88_v6 = vadd.f32 1e-05, %v84_v4 }
 0x12d   :  { %v82_v8 = vpop.xlane.xlu0 %81 }
 0x12e   :  { %1733 = vrsqrt.f32 %v89_v5  ;;  %v86_v9 = vmul.f32 0.03125, %v82_v8 }
 0x12f   :  { %1735 = vrsqrt.f32 %v88_v6 }
 0x130   :  { %v90_v12 = vadd.f32 1e-05, %v86_v9 }
 0x132   :  { %1737 = vrsqrt.f32 %v90_v12 }
 0x134   :  { %v1732_v13 = vpop.eup %1731 }
 0x135   :  { %v95_v14 = vmul.f32 %v1732_v13, %v1898_v24  ;;  %v592_v13 = vsub.s32 2, %v1886_v11 }
 0x136   :  { %v258_v15 = vpop.xlane.xlu1 %257 }
 0x137   :  { %1535 = vmatprep.mubr.msk.f32.mxu1 %vm45_vm0, %v95_v14  ;;  %v259_v18 = vmul.f32 0.03125, %v258_v15  ;;  %v596_v14 = vsub.s32 3, %v1886_v11 }
 0x138   :  { %v1734_v17 = vpop.eup %1733 }
 0x139   :  { %v1736_v19 = vpop.eup %1735  ;;  %v97_v20 = vmul.f32 %v1734_v17, %v1900_v25  ;;  %v260_v21 = vadd.f32 1e-05, %v259_v18 }
 0x13a   :  { %v96_v22 = vmul.f32 %v1736_v19, %v1906_v32 }
 0x13b   :  { %1739 = vrsqrt.f32 %v260_v21 }
 0x13c   :  { %v1738_v23 = vpop.eup %1737  ;;  %1536 = vmatmul.mubr.msk.f32.vlgmr.msra.gmra.mrb[0].mxu1 %vm45_vm0, %v96_v22 }
 0x13d   :  { %1538 = vmatprep.mubr.msk.f32.mxu1 %vm45_vm0, %v97_v20  ;;  %v98_v26 = vmul.f32 %v1738_v23, %v1908_v33  ;;  %1647 = vmatpush3.bf16.msra.mxu1 %v1637_v56  ;;  %v1454_v33 = vld [vmem:[%s2257_s6] ss:$0 sm:$0xff] }
 0x13e   :  { %1648 = vmatprep.subr.bf16.mxu1 %v1808_v60 }
 0x140   :  { %1539 = vmatmul.mubr.msk.f32.gmra.mrb[2].mxu1 %vm45_vm0, %v98_v26 }
 0x141   :  { %1650 = vmatpush3.bf16.msra.mxu1 %v1641_v59  ;;  %1549 = vmatprep.mubr.msk.f32.mxu1 %vm1809_vm2, %v1810_v61 }
 0x142   :  { %1651 = vmatprep.subr.bf16.mxu1 %v1808_v60 }
 0x145   :  { %v1740_v24 = vpop.eup %1739 }
 0x146   :  { %v266_v25 = vrot.slane %v1740_v24, %v1912_v35  ;;  %v270_v27 = vrot.slane %v1740_v24, %v1915_v36 }
 0x148   :  { %v273_v28 = vmul.f32 %v266_v25, %v1927_v46  ;;  %v274_v29 = vmul.f32 %v270_v27, %v1930_v47 }
 0x14a   :  { %v277_v30 = vcombine.low %v273_v28, %v274_v29 }
 0x14c   :  { %v284_v31 = vrot.slane %v277_v30, %v1893_v16 }
 0x14e   :  { %v291_v32 = vrot.slane %v284_v31, %v1893_v16 }
 0x150   :  { %1550 = vmatmul.mubr.msk.f32.vlgmr.msra.gmra.mrb[4].mxu1 %vm45_vm0, %v291_v32 }
 0x151   :  { %1556 = vmatprep.mubr.msk.f32.mxu1 %vm1809_vm2, %v1810_v61 }
 0x20f   :  { %v1537_v34 = vpop.f32.mrb[0].mxu1 }
 0x210   :  { %v187_v37 = vadd.f32 %v1537_v34, %v1454_v33  ;;  %v181_v38 = vpop.f32.mrb[1].mxu1 }
 0x211   :  { %v182_v39 = vadd.f32 %v1454_v33, %v181_v38 }
 0x213   :  { %v1979_v40 = vpack.i.bf16 %v187_v37, %v182_v39  ;;  %v1540_v41 = vpop.f32.mrb[2].mxu1 }
 0x214   :  { %v197_v42 = vadd.f32 %v1540_v41, %v1454_v33  ;;  %v191_v43 = vpop.f32.mrb[3].mxu1 }
 0x215   :  { %v192_v44 = vadd.f32 %v1454_v33, %v191_v43  ;;  %1712 = vrot.lane.b32.xlu0 %v1979_v40, %s1811_s24 }
 0x217   :  { %v1982_v45 = vpack.i.bf16 %v197_v42, %v192_v44 }
 0x219   :  { %1717 = vrot.lane.b32.xlu1 %v1982_v45, %s1811_s24 }
 0x223   :  { %v360_v46 = vpop.f32.mrb[4].mxu1 }
 0x224   :  { %v361_v47 = vadd.f32 %v1454_v33, %v360_v46  ;;  %v1551_v48 = vpop.f32.mrb[5].mxu1 }
 0x226   :  { %v371_v49 = vrot.slane %v361_v47, %v1893_v16 }
 0x228   :  { %v372_v50 = vcombine.high %v371_v49, %v371_v49  ;;  %v379_v51 = vrot.slane %v371_v49, %v1893_v16 }
 0x22a   :  { %v1988_v52 = vrot.slane %v379_v51, %v1912_v35  ;;  %v386_v53 = vrot.slane %v372_v50, %v1893_v16 }
 0x22c   :  { %565 = vrot.lane.b32.xlu1 %v1988_v52, %s1811_s24  ;;  %v1993_v54 = vrot.slane %v386_v53, %v1912_v35  ;;  %v397_v1 = vmul.f32 %v1988_v52, %v2002_v62 }
 0x22e   :  { %v398_v3 = vmul.f32 %v1993_v54, %v2002_v62 }
 0x230   :  { %567 = vrot.lane.b32.xlu1 %v1993_v54, %s1811_s24 }
 0x287   :  { %v1713_v55 = vpop.permute.xlu0 %1712 }
 0x288   :  { %v1715_v56 = vunpack.i.h.bf16 %v1713_v55  ;;  %v1714_v57 = vunpack.i.l.bf16 %v1713_v55 }
 0x28a   :  { %v1652_v58 = vpack.c.bf16 %v1715_v56, %v1714_v57 }
 0x28b   :  { %v1718_v59 = vpop.permute.xlu1 %1717 }
 0x28c   :  { %1654 = vmatpush3.bf16.xpose.msk.msra.mxu1 %vm1653_vm3, %v1652_v58  ;;  %v1720_v63 = vunpack.i.h.bf16 %v1718_v59  ;;  %v1719_v0 = vunpack.i.l.bf16 %v1718_v59 }
 0x28d   :  { %1655 = vmatprep.subr.bf16.mxu1 %v1808_v60 }
 0x28e   :  { %v1656_v2 = vpack.c.bf16 %v1720_v63, %v1719_v0 }
 0x293   :  { %1557 = vmatmul.mubr.msk.f32.vlgmr.msra.gmra.mrb[6].mxu1 %vm45_vm0, %v397_v1 }
 0x294   :  { %1658 = vmatpush3.bf16.xpose.msk.msra.mxu1 %vm1653_vm3, %v1656_v2  ;;  %1563 = vmatprep.mubr.msk.f32.mxu1 %vm1809_vm2, %v1810_v61 }
 0x295   :  { %1662 = vmatprep.subr.bf16.mxu1 %v1808_v60 }
 0x29b   :  { %1564 = vmatmul.mubr.msk.f32.vlgmr.msra.gmra.mrb[8].mxu1 %vm45_vm0, %v398_v3 }
 0x29c   :  { %1577 = vmatprep.mubr.msk.f32.mxu1 %vm1809_vm2, %v1810_v61 }
 0x29e   :  { %v566_v4 = vpop.permute.xlu1 %565 }
 0x29f   :  { %v571_v5 = vmul.f32 %v566_v4, %v397_v1 }
 0x2a1   :  { %v574_v6 = vsel %vm573_vm4, %v571_v5, 0.0 }
 0x2a2   :  { %575 = vadd.xlane.f32.xlu0 %v574_v6  ;;  %v568_v8 = vpop.permute.xlu1 %567 }
 0x2a3   :  { %v572_v9 = vmul.f32 %v568_v8, %v398_v3 }
 0x2a5   :  { %v577_v12 = vsel %vm573_vm4, %v572_v9, 0.0 }
 0x2a6   :  { %578 = vadd.xlane.f32.xlu1 %v577_v12 }
 0x32f   :  { %v576_v15 = vpop.xlane.xlu0 %575 }
 0x330   :  { %v585_v17 = vrot.slane %v576_v15, %v1912_v35  ;;  %v593_v18 = vrot.slane %v576_v15, %v592_v13  ;;  %v589_v19 = vrot.slane %v576_v15, %v1915_v36  ;;  %v597_v20 = vrot.slane %v576_v15, %v596_v14 }
 0x332   :  { %623 = vst.msk [vmem:[#allocation4] sm:$0x1] %vm622_vm5, %v585_v17  ;;  %625 = vst.msk [vmem:[#allocation4 + $0x2] sm:$0x1] %vm622_vm5, %v593_v18  ;;  %v969_v18 = vld [vmem:[%s2254_s3 + $0x18] sm:$0xff] }
 0x333   :  { %624 = vst.msk [vmem:[#allocation4 + $0x1] sm:$0x1] %vm622_vm5, %v589_v19  ;;  %626 = vst.msk [vmem:[#allocation4 + $0x3] sm:$0x1] %vm622_vm5, %v597_v20  ;;  %v579_v21 = vpop.xlane.xlu1 %578 }
 0x334   :  { %v601_v22 = vrot.slane %v579_v21, %v1912_v35  ;;  %v609_v11 = vrot.slane %v579_v21, %v592_v13  ;;  %v605_v23 = vrot.slane %v579_v21, %v1915_v36  ;;  %v613_v26 = vrot.slane %v579_v21, %v596_v14 }
 0x336   :  { %627 = vst.msk [vmem:[#allocation4 + $0x4] sm:$0x1] %vm622_vm5, %v601_v22  ;;  %629 = vst.msk [vmem:[#allocation4 + $0x6] sm:$0x1] %vm622_vm5, %v609_v11 }
 0x337   :  { %628 = vst.msk [vmem:[#allocation4 + $0x5] sm:$0x1] %vm622_vm5, %v605_v23  ;;  %630 = vst.msk [vmem:[#allocation4 + $0x7] sm:$0x1] %vm622_vm5, %v613_v26 }
 0x366   :  { %v2031_v24 = vpop.f32.mrb[6].mxu1 }
 0x367   :  { %v1558_v25 = vpop.f32.mrb[7].mxu1  ;;  %v747_v27 = vsel %vm746_vm6, %v2031_v24, -inf }
 0x368   :  { %748 = vmax.xlane.f32.xlu0 %v747_v27 }
 0x36e   :  { %v2035_v28 = vpop.f32.mrb[8].mxu1 }
 0x36f   :  { %v1565_v29 = vpop.f32.mrb[9].mxu1  ;;  %v750_v30 = vsel %vm746_vm6, %v2035_v28, -inf }
 0x370   :  { %751 = vmax.xlane.f32.xlu0 %v750_v30 }
 0x3f5   :  { %v749_v31 = vpop.xlane.xlu0 %748 }
 0x3f6   :  { %v753_v32 = vmax.f32 %v749_v31, %v576_v15 }
 0x3f8   :  { %v761_v33 = vsub.f32 %v2031_v24, %v753_v32  ;;  %v755_v47 = vsub.f32 %v576_v15, %v753_v32  ;;  %v967_v15 = vld [vmem:[%s2254_s3 + $0x8] sm:$0xff] }
 0x3fa   :  { %v763_v34 = vmul.f32 1.442695, %v761_v33  ;;  %v757_v48 = vmul.f32 1.442695, %v755_v47 }
 0x3fc   :  { %1741 = vpow2.f32 %v763_v34 }
 0x3fd   :  { %v752_v37 = vpop.xlane.xlu0 %751 }
 0x3fe   :  { %v754_v38 = vmax.f32 %v752_v37, %v579_v21 }
 0x400   :  { %v762_v39 = vsub.f32 %v2035_v28, %v754_v38  ;;  %v756_v49 = vsub.f32 %v579_v21, %v754_v38 }
 0x402   :  { %v765_v41 = vmul.f32 1.442695, %v762_v39  ;;  %v759_v50 = vmul.f32 1.442695, %v756_v49 }
 0x404   :  { %1743 = vpow2.f32 %v765_v41 }
 0x405   :  { %1745 = vpow2.f32 %v757_v48 }
 0x406   :  { %v1742_v42 = vpop.eup %1741  ;;  %1747 = vpow2.f32 %v759_v50 }
 0x407   :  { %v767_v43 = vsel %vm746_vm6, %v1742_v42, 0.0 }
 0x408   :  { %768 = vadd.xlane.f32.xlu0 %v767_v43 }
 0x40e   :  { %v1744_v44 = vpop.eup %1743 }
 0x40f   :  { %v770_v46 = vsel %vm746_vm6, %v1744_v44, 0.0  ;;  %v1746_v51 = vpop.eup %1745 }
 0x410   :  { %771 = vadd.xlane.f32.xlu1 %v770_v46  ;;  %v1748_v63 = vpop.eup %1747 }
 0x41e   :  { %1722 = vrot.lane.b32.xlu0 %v1979_v40, %s1812_s27 }
 0x421   :  { %1727 = vrot.lane.b32.xlu1 %v1982_v45, %s1812_s27 }
 0x495   :  { %v769_v53 = vpop.xlane.xlu0 %768 }
 0x496   :  { %v773_v55 = vadd.f32 %v1746_v51, %v769_v53 }
 0x498   :  { %1749 = vrcp.f32 %v773_v55 }
 0x499   :  { %v1723_v56 = vpop.permute.xlu0 %1722 }
 0x49a   :  { %v1725_v57 = vunpack.i.h.bf16 %v1723_v56  ;;  %v1724_v58 = vunpack.i.l.bf16 %v1723_v56 }
 0x49c   :  { %v1660_v59 = vpack.c.bf16 %v1725_v57, %v1724_v58 }
 0x49d   :  { %v772_v0 = vpop.xlane.xlu1 %771 }
 0x49e   :  { %v774_v40 = vadd.f32 %v1748_v63, %v772_v0  ;;  %1661 = vmatpush3.bf16.msra.mxu0 %v1660_v59 }
 0x49f   :  { %1665 = vmatprep.subr.bf16.mxu0 %v1808_v60 }
 0x4a0   :  { %1751 = vrcp.f32 %v774_v40 }
 0x4a1   :  { %v1728_v45 = vpop.permute.xlu1 %1727 }
 0x4a2   :  { %v1750_v1 = vpop.eup %1749  ;;  %v1730_v2 = vunpack.i.h.bf16 %v1728_v45  ;;  %v1729_v3 = vunpack.i.l.bf16 %v1728_v45 }
 0x4a3   :  { %v779_v4 = vmul.f32 %v1750_v1, %v1742_v42  ;;  %v776_v5 = vmul.f32 %v1750_v1, %v1746_v51 }
 0x4a4   :  { %v1663_v6 = vpack.c.bf16 %v1730_v2, %v1729_v3 }
 0x4a5   :  { %1571 = vmatmul.mubr.msk.f32.vlgmr.msra.gmra.mrb[0].mxu0 %vm793_vm7, %v779_v4  ;;  %v781_v8 = vmul.f32 %v776_v5, %v1988_v52  ;;  %v966_v52 = vld [vmem:[%s2254_s3] sm:$0xff] }
 0x4a6   :  { %1664 = vmatpush3.bf16.msra.mxu1 %v1663_v6  ;;  %1588 = vmatprep.mubr.msk.f32.mxu0 %vm1809_vm2, %v1810_v61  ;;  %v1666_v17 = vpack.c.bf16 %v967_v15, %v966_v52 }
 0x4a7   :  { %790 = vrot.lane.b32.xlu1 %v781_v8, %s1812_s27  ;;  %1671 = vmatprep.subr.bf16.mxu1 %v1808_v60 }
 0x4a8   :  { %1667 = vmatpush3.bf16.msra.mxu0 %v1666_v17 }
 0x4a9   :  { %1668 = vmatprep.subr.bf16.mxu0 %v1808_v60 }
 0x4aa   :  { %v1752_v9 = vpop.eup %1751 }
 0x4ab   :  { %v780_v12 = vmul.f32 %v1752_v9, %v1744_v44  ;;  %v778_v13 = vmul.f32 %v1752_v9, %v1748_v63 }
 0x4ad   :  { %1578 = vmatmul.mubr.msk.f32.vlgmr.msra.gmra.mrb[10].mxu1 %vm793_vm7, %v780_v12  ;;  %v782_v14 = vmul.f32 %v778_v13, %v1993_v54  ;;  %v968_v54 = vld [vmem:[%s2254_s3 + $0x10] sm:$0xff] }
 0x4ae   :  { %1599 = vmatprep.mubr.msk.f32.mxu1 %vm1809_vm2, %v1810_v61  ;;  %v1669_v19 = vpack.c.bf16 %v969_v18, %v968_v54 }
 0x4af   :  { %874 = vrot.lane.b32.xlu1 %v782_v14, %s1812_s27 }
 0x4b0   :  { %1670 = vmatpush3.bf16.msra.mxu0 %v1669_v19 }
 0x4b1   :  { %1677 = vmatprep.subr.bf16.mxu0 %v1808_v60 }
 0x519   :  { %v791_v20 = vpop.permute.xlu1 %790 }
 0x521   :  { %v875_v27 = vpop.permute.xlu1 %874 }
 0x578   :  { %v863_v21 = vpop.f32.mrb[0].mxu0 }
 0x579   :  { %v864_v22 = vadd.f32 %v863_v21, %v791_v20  ;;  %v1572_v11 = vpop.f32.mrb[1].mxu0 }
 0x57b   :  { %v950_v23 = vmul.f32 %v864_v22, %v2002_v62 }
 0x57d   :  { %v952_v26 = vsel %vm573_vm4, %v950_v23, 0.0 }
 0x57e   :  { %v953_v25 = vrot.slane %v952_v26, 4 }
 0x580   :  { %v954_v29 = vadd.f32 %v953_v25, %v952_v26  ;;  %v946_v30 = vpop.f32.mrb[10].mxu1 }
 0x581   :  { %v947_v31 = vadd.f32 %v946_v30, %v875_v27  ;;  %v1579_v32 = vpop.f32.mrb[11].mxu1 }
 0x582   :  { %v955_v34 = vrot.slane %v954_v29, 2 }
 0x583   :  { %v951_v33 = vmul.f32 %v947_v31, %v2002_v62  ;;  %v1469_v62 = vld [vmem:[%s2257_s6 + $0x1] ss:$0 sm:$0xff] }
 0x584   :  { %v956_v39 = vadd.f32 %v955_v34, %v954_v29  ;;  %v1084_v50 = vrot.slane %v1469_v62, %v1893_v16 }
 0x585   :  { %v959_v37 = vsel %vm573_vm4, %v951_v33, 0.0 }
 0x586   :  { %v960_v38 = vrot.slane %v959_v37, 4  ;;  %v957_v43 = vrot.slane %v956_v39, 1  ;;  %v1085_v55 = vcombine.high %v1084_v50, %v1084_v50 }
 0x588   :  { %v961_v41 = vadd.f32 %v960_v38, %v959_v37  ;;  %v958_v47 = vadd.f32 %v957_v43, %v956_v39  ;;  %v1099_v0 = vrot.slane %v1085_v55, %v1893_v16 }
 0x58a   :  { %v962_v42 = vrot.slane %v961_v41, 2 }
 0x58c   :  { %v963_v44 = vadd.f32 %v962_v42, %v961_v41 }
 0x58e   :  { %v964_v46 = vrot.slane %v963_v44, 1 }
 0x590   :  { %v965_v48 = vadd.f32 %v964_v46, %v963_v44  ;;  %v1178_v44 = vld [vmem:[%s2255_s4] sm:$0xff]  ;;  %v1179_v46 = vld [vmem:[%s2255_s4 + $0x8] sm:$0xff] }
 0x592   :  { %v973_v49 = vsel %vm972_vm8, %v965_v48, %v958_v47  ;;  %v1672_v47 = vpack.c.bf16 %v1179_v46, %v1178_v44  ;;  %v1180_v48 = vld [vmem:[%s2255_s4 + $0x10] sm:$0xff] }
 0x593   :  { %1589 = vmatmul.mubr.msk.f32.vlgmr.msra.gmra.mrb[2].mxu0 %vm45_vm0, %v973_v49  ;;  %v1181_v49 = vld [vmem:[%s2255_s4 + $0x18] sm:$0xff] }
 0x594   :  { %1634 = vmatprep.mubr.msk.f32.mxu0 %vm1809_vm2, %v1810_v61  ;;  %v1092_v61 = vrot.slane %v1084_v50, %v1893_v16  ;;  %1673 = vmatpush3.bf16.msra.mxu1 %v1672_v47  ;;  %v1675_v62 = vpack.c.bf16 %v1181_v49, %v1180_v48 }
 0x595   :  { %1674 = vmatprep.subr.bf16.mxu1 %v1808_v60 }
 0x598   :  { %1676 = vmatpush3.bf16.msra.mxu1 %v1675_v62 }
 0x666   :  { %v1042_v51 = vpop.f32.mrb[2].mxu0 }
 0x667   :  { %v1053_v53 = vrot.slane %v1042_v51, %v1893_v16  ;;  %v1590_v56 = vpop.f32.mrb[3].mxu0 }
 0x669   :  { %v1054_v57 = vcombine.high %v1053_v53, %v1053_v53  ;;  %v1061_v58 = vrot.slane %v1053_v53, %v1893_v16 }
 0x66b   :  { %v1068_v59 = vrot.slane %v1054_v57, %v1893_v16  ;;  %v1071_v63 = vadd.f32 %v1061_v58, %v1879_v7  ;;  %v639_v7 = vrot.slane %v2031_v24, %v1893_v16 }
 0x66d   :  { %v1072_v40 = vadd.f32 %v1068_v59, %v1884_v10  ;;  %v2089_v45 = vadd.f32 %v1092_v61, %v1071_v63  ;;  %v647_v6 = vrot.slane %v639_v7, %v1893_v16  ;;  %v663_v10 = vrot.slane %v2035_v28, %v1893_v16 }
 0x66e   :  { %v640_v31 = vcombine.high %v639_v7, %v639_v7  ;;  %v1304_v7 = vld [vmem:[%s2256_s5 + $0x10] sm:$0xff] }
 0x66f   :  { %v2091_v1 = vadd.f32 %v1099_v0, %v1072_v40  ;;  %v684_v8 = vrot.slane %v647_v6, %v1912_v35  ;;  %v655_v9 = vcombine.high %v647_v6, %v647_v6  ;;  %v671_v12 = vrot.slane %v663_v10, %v1893_v16  ;;  %v1305_v6 = vld [vmem:[%s2256_s5 + $0x18] sm:$0xff] }
 0x670   :  { %v654_v32 = vrot.slane %v640_v31, %v1893_v16  ;;  %v664_v33 = vcombine.high %v663_v10, %v663_v10  ;;  %v1681_v10 = vpack.c.bf16 %v1305_v6, %v1304_v7 }
 0x671   :  { %v1106_v2 = vcombine.low %v2089_v45, %v2091_v1  ;;  %v692_v13 = vrot.slane %v655_v9, %v1912_v35  ;;  %v700_v14 = vrot.slane %v671_v12, %v1912_v35  ;;  %v679_v24 = vcombine.high %v671_v12, %v671_v12  ;;  %v1307_v9 = vld [vmem:[%s2256_s5 + $0x28] sm:$0xff] }
 0x672   :  { %v688_v34 = vrot.slane %v654_v32, %v1912_v35  ;;  %v656_v37 = vcombine.high %v654_v32, %v654_v32  ;;  %v678_v39 = vrot.slane %v664_v33, %v1893_v16 }
 0x673   :  { %v1113_v3 = vrot.slane %v1106_v2, %v1893_v16  ;;  %v708_v52 = vrot.slane %v679_v24, %v1912_v35 }
 0x674   :  { %v696_v38 = vrot.slane %v656_v37, %v1912_v35  ;;  %v704_v41 = vrot.slane %v678_v39, %v1912_v35  ;;  %v680_v42 = vcombine.high %v678_v39, %v678_v39 }
 0x675   :  { %v1120_v4 = vrot.slane %v1113_v3, %v1893_v16 }
 0x676   :  { %v712_v43 = vrot.slane %v680_v42, %v1912_v35 }
 0x677   :  { %v1122_v5 = vsel %vm218_vm1, %v1120_v4, 0.0 }
 0x678   :  { %1123 = vadd.xlane.f32.xlu0 %v1122_v5  ;;  %v1302_v5 = vld [vmem:[%s2256_s5] sm:$0xff] }
 0x68e   :  { %713 = vrot.lane.b32.xlu0 %v684_v8, %s1813_s15  ;;  %v1306_v8 = vld [vmem:[%s2256_s5 + $0x20] sm:$0xff] }
 0x68f   :  { %v1684_v12 = vpack.c.bf16 %v1307_v9, %v1306_v8 }
 0x692   :  { %717 = vrot.lane.b32.xlu0 %v692_v13, %s1813_s15  ;;  %v1308_v13 = vld [vmem:[%s2256_s5 + $0x30] sm:$0xff] }
 0x696   :  { %721 = vrot.lane.b32.xlu0 %v700_v14, %s1813_s15  ;;  %v1309_v14 = vld [vmem:[%s2256_s5 + $0x38] sm:$0xff] }
 0x697   :  { %v1687_v24 = vpack.c.bf16 %v1309_v14, %v1308_v13 }
 0x69a   :  { %725 = vrot.lane.b32.xlu0 %v708_v52, %s1813_s15  ;;  %v1310_v52 = vld [vmem:[%s2256_s5 + $0x40] sm:$0xff] }
 0x705   :  { %v1124_v28 = vpop.xlane.xlu0 %1123 }
 0x706   :  { %v1125_v15 = vmul.f32 0.03125, %v1124_v28  ;;  %v1311_v28 = vld [vmem:[%s2256_s5 + $0x48] sm:$0xff] }
 0x708   :  { %v1130_v17 = vrot.slane %v1125_v15, %v1912_v35  ;;  %v1134_v54 = vrot.slane %v1125_v15, %v1915_v36  ;;  %v1690_v15 = vpack.c.bf16 %v1311_v28, %v1310_v52 }
 0x709   :  { %v714_v18 = vpop.permute.xlu0 %713 }
 0x70a   :  { %v1137_v19 = vsub.f32 %v2089_v45, %v1130_v17  ;;  %v1138_v20 = vsub.f32 %v2091_v1, %v1134_v54  ;;  %738 = vst.msk [vmem:[#allocation4] sm:$0x1] %vm737_vm9, %v714_v18  ;;  %v1312_v17 = vld [vmem:[%s2256_s5 + $0x50] sm:$0xff]  ;;  %v1313_v54 = vld [vmem:[%s2256_s5 + $0x58] sm:$0xff] }
 0x70b   :  { %v1693_v18 = vpack.c.bf16 %v1313_v54, %v1312_v17 }
 0x70c   :  { %v1139_v21 = vmul.f32 %v1137_v19, %v1137_v19  ;;  %v1140_v22 = vmul.f32 %v1138_v20, %v1138_v20 }
 0x70d   :  { %v718_v11 = vpop.permute.xlu0 %717 }
 0x70e   :  { %740 = vst.msk [vmem:[#allocation4 + $0x2] sm:$0x1] %vm737_vm9, %v718_v11  ;;  %v1143_v23 = vcombine.low %v1139_v21, %v1140_v22  ;;  %v1316_v22 = vld [vmem:[%s2256_s5 + $0x70] sm:$0xff]  ;;  %v1317_v11 = vld [vmem:[%s2256_s5 + $0x78] sm:$0xff] }
 0x710   :  { %v1150_v26 = vrot.slane %v1143_v23, %v1893_v16  ;;  %v1699_v23 = vpack.c.bf16 %v1317_v11, %v1316_v22 }
 0x711   :  { %v722_v25 = vpop.permute.xlu0 %721 }
 0x712   :  { %742 = vst.msk [vmem:[#allocation4 + $0x4] sm:$0x1] %vm737_vm9, %v722_v25  ;;  %v1157_v27 = vrot.slane %v1150_v26, %v1893_v16  ;;  %v1470_v26 = vld [vmem:[%s2257_s6 + $0x2] ss:$0 sm:$0xff] }
 0x714   :  { %v1159_v29 = vsel %vm218_vm1, %v1157_v27, 0.0 }
 0x715   :  { %1160 = vadd.xlane.f32.xlu1 %v1159_v29  ;;  %v726_v30 = vpop.permute.xlu0 %725 }
 0x716   :  { %744 = vst.msk [vmem:[#allocation4 + $0x6] sm:$0x1] %vm737_vm9, %v726_v30 }
 0x726   :  { %715 = vrot.lane.b32.xlu1 %v688_v34, %s1813_s15 }
 0x72a   :  { %719 = vrot.lane.b32.xlu1 %v696_v38, %s1813_s15 }
 0x72e   :  { %723 = vrot.lane.b32.xlu1 %v704_v41, %s1813_s15 }
 0x732   :  { %727 = vrot.lane.b32.xlu1 %v712_v43, %s1813_s15 }
 0x7a2   :  { %v1161_v50 = vpop.xlane.xlu1 %1160 }
 0x7a3   :  { %v1162_v51 = vmul.f32 0.03125, %v1161_v50 }
 0x7a5   :  { %v1163_v53 = vadd.f32 1e-05, %v1162_v51 }
 0x7a6   :  { %v716_v55 = vpop.permute.xlu1 %715 }
 0x7a7   :  { %1753 = vrsqrt.f32 %v1163_v53  ;;  %739 = vst.msk [vmem:[#allocation4 + $0x1] sm:$0x1] %vm737_vm9, %v716_v55 }
 0x7aa   :  { %v720_v56 = vpop.permute.xlu1 %719 }
 0x7ab   :  { %741 = vst.msk [vmem:[#allocation4 + $0x3] sm:$0x1] %vm737_vm9, %v720_v56 }
 0x7ae   :  { %v724_v57 = vpop.permute.xlu1 %723 }
 0x7af   :  { %743 = vst.msk [vmem:[#allocation4 + $0x5] sm:$0x1] %vm737_vm9, %v724_v57 }
 0x7b1   :  { %v1754_v58 = vpop.eup %1753 }
 0x7b2   :  { %v1169_v59 = vrot.slane %v1754_v58, %v1912_v35  ;;  %v1173_v63 = vrot.slane %v1754_v58, %v1915_v36  ;;  %v728_v61 = vpop.permute.xlu1 %727  ;;  %v1303_v35 = vld [vmem:[%s2256_s5 + $0x8] sm:$0xff] }
 0x7b3   :  { %745 = vst.msk [vmem:[#allocation4 + $0x7] sm:$0x1] %vm737_vm9, %v728_v61  ;;  %v1678_v36 = vpack.c.bf16 %v1303_v35, %v1302_v5 }
 0x7b4   :  { %v1176_v0 = vmul.f32 %v1169_v59, %v1137_v19  ;;  %v1177_v40 = vmul.f32 %v1173_v63, %v1138_v20  ;;  %v1314_v19 = vld [vmem:[%s2256_s5 + $0x60] sm:$0xff]  ;;  %v1315_v20 = vld [vmem:[%s2256_s5 + $0x68] sm:$0xff]  ;;  %s1814_s5 = smov [#allocation4]  }
 0x7b5   :  { %1679 = vmatpush3.bf16.msra.mxu0 %v1678_v36  ;;  %v1696_v21 = vpack.c.bf16 %v1315_v20, %v1314_v19  ;;  %s1439_s28 = sshll.u32 %s1814_s5, 4  ;;  %s1440_s28 = int_to_ptr.vmem [resolvable:$true] %s1439_s28 }
 0x7b6   :  { %v1188_v2 = vcombine.low %v1176_v0, %v1177_v40  ;;  %1680 = vmatprep.subr.bf16.mxu0 %v1808_v60  ;;  %s1759_s29 = scalar_lea.vmem %s1440_s28, 128  ;;  %p1764_p1 = scmp.lt.s32.totalorder %s1440_s28, %s1440_s28 }
 0x7b7   :  { %p1760_p0 = scmp.ne.s32.totalorder %s1440_s28, %s1759_s29  ;;  %p1765_p2 = scmp.lt.s32.totalorder %s1759_s29, %s1759_s29 }
 0x7b8   :  { %v1195_v3 = vrot.slane %v1188_v2, %v1893_v16 }
 0x7b9   :  { %1682 = vmatpush3.bf16.msra.mxu0 %v1681_v10  ;;  %p1766_p3 = por %p1765_p2, %p1764_p1 }
 0x7ba   :  { %v1202_v4 = vrot.slane %v1195_v3, %v1893_v16  ;;  %1683 = vmatprep.subr.bf16.mxu0 %v1808_v60 }
 0x7bb   :  { %p1767_p4 = pnand %p1766_p3, %p1760_p0 }
 0x7bc   :  { %1600 = vmatmul.mubr.msk.f32.vlgmr.msra.gmra.mrb[12].mxu1 %vm45_vm0, %v1202_v4 }
 0x7bd   :  { %1685 = vmatpush3.bf16.msra.mxu0 %v1684_v12 }
 0x7be   :  { %1686 = vmatprep.subr.bf16.mxu0 %v1808_v60 }
 0x7c1   :  { %1688 = vmatpush3.bf16.msra.mxu0 %v1687_v24 }
 0x7c2   :  { %1689 = vmatprep.subr.bf16.mxu0 %v1808_v60 }
 0x7c5   :  { %1691 = vmatpush3.bf16.msra.mxu0 %v1690_v15 }
 0x7c6   :  { %1692 = vmatprep.subr.bf16.mxu0 %v1808_v60 }
 0x7c9   :  { %1694 = vmatpush3.bf16.msra.mxu0 %v1693_v18 }
 0x7ca   :  { %1695 = vmatprep.subr.bf16.mxu0 %v1808_v60 }
 0x7cd   :  { %1697 = vmatpush3.bf16.msra.mxu0 %v1696_v21 }
 0x7ce   :  { %1698 = vmatprep.subr.bf16.mxu0 %v1808_v60 }
 0x7d1   :  { %1700 = vmatpush3.bf16.msra.mxu0 %v1699_v23 }
 0x88f   :  { %v1271_v25 = vpop.f32.mrb[12].mxu1 }
 0x890   :  { %v1272_v27 = vadd.f32 %v1470_v26, %v1271_v25  ;;  %v1601_v29 = vpop.f32.mrb[13].mxu1 }
 0x892   :  { %v1275_v30 = vmul.f32 0.70710677, %v1272_v27  ;;  %v1299_v56 = vmul.f32 0.5, %v1272_v27 }
 0x894   :  { %v1276_v31 = vand.u32 2147483647, %v1275_v30  ;;  %vm1296_vm10 = vcmp.ge.f32.partialorder %v1275_v30, 0.0 }
 0x896   :  { %v1277_v60 = vmul.f32 0.3275911, %v1276_v31  ;;  %v1290_v33 = vsub.f32 0.0, %v1276_v31 }
 0x898   :  { %v1278_v32 = vadd.f32 1.0, %v1277_v60  ;;  %v1291_v37 = vmul.f32 %v1290_v33, %v1276_v31 }
 0x89a   :  { %1755 = vrcp.f32 %v1278_v32  ;;  %v1292_v41 = vmul.f32 1.442695, %v1291_v37 }
 0x89c   :  { %1757 = vpow2.f32 %v1292_v41 }
 0x8a4   :  { %v1756_v34 = vpop.eup %1755 }
 0x8a5   :  { %v1281_v38 = vmul.f32 1.0614054, %v1756_v34 }
 0x8a6   :  { %v1758_v62 = vpop.eup %1757 }
 0x8a7   :  { %v1472_v39 = vadd.f32 -1.4531521, %v1281_v38 }
 0x8a9   :  { %v1283_v42 = vmul.f32 %v1756_v34, %v1472_v39 }
 0x8ab   :  { %v1284_v43 = vadd.f32 1.4214138, %v1283_v42 }
 0x8ad   :  { %v1285_v44 = vmul.f32 %v1756_v34, %v1284_v43 }
 0x8af   :  { %v1473_v46 = vadd.f32 -0.28449672, %v1285_v44 }
 0x8b1   :  { %v1287_v47 = vmul.f32 %v1756_v34, %v1473_v46 }
 0x8b3   :  { %v1288_v48 = vadd.f32 0.2548296, %v1287_v47 }
 0x8b5   :  { %v1289_v49 = vmul.f32 %v1756_v34, %v1288_v48 }
 0x8b7   :  { %v1294_v50 = vmul.f32 %v1758_v62, %v1289_v49 }
 0x8b9   :  { %v1295_v51 = vsub.f32 1.0, %v1294_v50 }
 0x8bb   :  { %v1297_v53 = vsub.f32 0.0, %v1295_v51 }
 0x8bd   :  { %v1298_v55 = vsel %vm1296_vm10, %v1295_v51, %v1297_v53 }
 0x8be   :  { %v1300_v57 = vadd.f32 1.0, %v1298_v55 }
 0x8c0   :  { %v1301_v58 = vmul.f32 %v1300_v57, %v1299_v56 }
 0x8c2   :  { %1635 = vmatmul.mubr.f32.vlgmr.msra.gmra.mrb[4].mxu0 %v1301_v58 }
 0x8c3   :  { %1770 = shalt.err (!%p1767_p4)
}
 0x8c4   :  { %s1771_s10 = scalar_lea.hbm %s2259_s8, 128 }
 0x8c5   :  { %p1772_p5 = scmp.ne.s32.totalorder %s2259_s8, %s1771_s10  ;;  %p1775_p6 = scmp.lt.u32.totalorder %s1771_s10, %s2259_s8 }
 0x8c7   :  { %p1777_p7 = pnand %p1775_p6, %p1772_p5 }
 0x8c9   :  { %1780 = shalt.err (!%p1777_p7)
}
 0x8ca   :  { %s1815_s14 = smov 16   ;;  %v1474_v59 = vld [vmem:[%s2257_s6 + $0x3] ss:$0 sm:$0xff]  ;;  %vm1419_vm11 = vcmask 253952   ;;  %s1816_s18 = smov [#allocation2]  }
 0x8cb   :  { %1445 = dma.vmem_to_hbm [thread:$0]  %s1440_s28, 128, %s2259_s8, [#allocation5], %s1815_s14, %s1815_s14, %s1813_s15  }
 0x8cc   :  { %s1427_s19 = sshll.u32 %s1816_s18, 4  ;;  %s1428_s19 = int_to_ptr.vmem [resolvable:$true] %s1427_s19 }
 0x8cd   :  { %s1781_s6 = scalar_lea.vmem %s1428_s19, 32  ;;  %p1786_p9 = scmp.lt.s32.totalorder %s1428_s19, %s1428_s19 }
 0x8ce   :  { %p1782_p8 = scmp.ne.s32.totalorder %s1428_s19, %s1781_s6  ;;  %p1787_p10 = scmp.lt.s32.totalorder %s1781_s6, %s1781_s6 }
 0x8d0   :  { %p1788_p11 = por %p1787_p10, %p1786_p9 }
 0x8d2   :  { %p1789_p12 = pnand %p1788_p11, %p1782_p8 }
 0x995   :  { %v1388_v63 = vpop.f32.mrb[4].mxu0 }
 0x996   :  { %v1389_v61 = vadd.f32 %v1474_v59, %v1388_v63  ;;  %v1636_v0 = vpop.f32.mrb[5].mxu0 }
 0x998   :  { %v1399_v40 = vrot.slane %v1389_v61, %v1893_v16 }
 0x99a   :  { %v1400_v2 = vcombine.high %v1399_v40, %v1399_v40  ;;  %v1407_v3 = vrot.slane %v1399_v40, %v1893_v16 }
 0x99c   :  { %v1414_v4 = vrot.slane %v1400_v2, %v1893_v16  ;;  %v1417_v5 = vadd.f32 %v1407_v3, %v2089_v45 }
 0x99e   :  { %v1418_v35 = vadd.f32 %v1414_v4, %v2091_v1  ;;  %1420 = vst.msk [vmem:[#allocation2] sm:$0x1] %vm1419_vm11, %v1417_v5 }
 0x9a0   :  { %1421 = vst.msk [vmem:[#allocation2 + $0x1] sm:$0x1] %vm1419_vm11, %v1418_v35 }
 0x9a1   :  { %1792 = shalt.err (!%p1789_p12)
}
 0x9a2   :  { %s1793_s21 = scalar_lea.hbm %s2258_s7, 32 }
 0x9a3   :  { %p1794_p13 = scmp.ne.s32.totalorder %s2258_s7, %s1793_s21  ;;  %p1797_p0 = scmp.lt.u32.totalorder %s1793_s21, %s2258_s7 }
 0x9a5   :  { %p1799_p1 = pnand %p1797_p0, %p1794_p13 }
 0x9a7   :  { %1802 = shalt.err (!%p1799_p1)
}
 0x9a8   :  { %1433 = dma.vmem_to_hbm [thread:$0]  %s1428_s19, 32, %s2258_s7, [#allocation3], %s1815_s14, %s1815_s14, %s1813_s15  }
 0x9a9   :  { %1803 = dma.done.wait [#allocation3], 32  }
 0x9aa   :  { %1804 = vsyncadd [#allocation3], 4294967264 }
 0x9ab   :  { %1805 = dma.done.wait [#allocation5], 128  }
 0x9ac   :  { %1806 = vsyncadd [#allocation5], 4294967168 }
 0x9ad   :  { %1452 = vsyncpa [#allocation3], 1 }
 0x9ae   :  { %1453 = vsyncpa [#allocation5], 1 }

</bundles_post_ra>
